<compile_context>
chip_gen: v6e
topology: v6e:2x2x1
jax: 0.10.0
libtpu: 0.0.40
codegen_flags: <defaults>
</compile_context>

<pallas_src>
import functools

import jax
import jax.numpy as jnp
from jax.experimental import pallas as pl
from jax.experimental.pallas import tpu as pltpu


# ----------------------------------------------------------------------------
# Kernels
# ----------------------------------------------------------------------------
def _ac_eval_kernel(state_ref, action_ref, w1_ref, b1_ref, w2_ref, b2_ref,
                    out_ref, *, num_actions):
    """Fused actor+critic evaluate for one batch tile.

    Output slab layout (lanes): [0:A) probs | A value | A+1 logp | A+2 entropy | 0-pad
    """
    # f32 state streamed from HBM; cast to bf16 right before the MXU.
    x = state_ref[...].astype(jnp.bfloat16)                       # [TM, D]

    # Fused layer 1 (actor | critic hidden): one MXU pass, f32 accumulate.
    h = jnp.dot(x, w1_ref[...], preferred_element_type=jnp.float32) + b1_ref[...]
    h = jnp.maximum(h, 0.0)

    # Fused layer 2: block-diagonal weights padded to a full 128-lane slab, so
    # y is already a lane-dense [TM, 128] slab:
    #   lanes [0, A) -> actor logits, lane A -> critic value, rest -> 0.
    y = jnp.dot(h.astype(jnp.bfloat16), w2_ref[...],
                preferred_element_type=jnp.float32) + b2_ref[...]

    col = jax.lax.broadcasted_iota(jnp.int32, y.shape, 1)
    act_mask = col < num_actions

    # Stable softmax over the action lanes.  Off-action lanes get a -30 shift
    # (exp ~ 1e-13) instead of a post-exp select; their contribution to the
    # denominator / entropy is negligible (<1e-10).
    m = jnp.max(jnp.where(act_mask, y, -jnp.inf), axis=-1, keepdims=True)
    shifted = jnp.where(act_mask, y - m, -30.0)
    e = jnp.exp(shifted)
    s = jnp.sum(e, axis=-1, keepdims=True)
    log_s = jnp.log(s)
    probs = e / s                        # exact normalization: sum(probs) == 1

    # log pi(a|s): masked gather via iota compare (a is [TM,1] int32, in-range).
    a = action_ref[...]
    logp = jnp.sum(jnp.where(col == a, shifted, 0.0),
                   axis=-1, keepdims=True) - log_s

    # Entropy: H = log(s) - sum_a p_a * (logit_a - m)   (reuses probs/shifted).
    ent = log_s - jnp.sum(probs * shifted, axis=-1, keepdims=True)

    # Single lane-dense store, built with nested selects (no adds).
    out_ref[...] = jnp.where(
        act_mask, probs,
        jnp.where(col == num_actions, y,                          # critic value
                  jnp.where(col == num_actions + 1, logp,
                            jnp.where(col == num_actions + 2, ent, 0.0))))


def _ac_act_kernel(state_ref, w1_ref, b1_ref, w2_ref, b2_ref, out_ref,
                   *, num_actions):
    """get_action path: probs + value only (no entropy / log-prob work)."""
    x = state_ref[...].astype(jnp.bfloat16)
    h = jnp.maximum(
        jnp.dot(x, w1_ref[...], preferred_element_type=jnp.float32) + b1_ref[...],
        0.0)
    y = jnp.dot(h.astype(jnp.bfloat16), w2_ref[...],
                preferred_element_type=jnp.float32) + b2_ref[...]

    col = jax.lax.broadcasted_iota(jnp.int32, y.shape, 1)
    act_mask = col < num_actions
    m = jnp.max(jnp.where(act_mask, y, -jnp.inf), axis=-1, keepdims=True)
    e = jnp.exp(jnp.where(act_mask, y - m, -30.0))
    s = jnp.sum(e, axis=-1, keepdims=True)
    probs = e / s                        # exact normalization

    # [probs | value (already at lane A in y) | zeros]
    out_ref[...] = jnp.where(act_mask, probs,
                             jnp.where(col == num_actions, y, 0.0))


# ----------------------------------------------------------------------------
# Wrappers
# ----------------------------------------------------------------------------
def _round_up(x, m):
    return -(-x // m) * m


def _tile_rows(batch):
    # Small batches: one tile.  Medium batches: exactly 2 tiles so
    # dimension_semantics=("parallel",) can shard across v7x's 2 TensorCores.
    # Large batches: 1024-row tiles to amortize ~0.35 us/step pipeline overhead;
    # double-buffered [TM,128] f32 output + temps stay well under the 32 MiB
    # scoped-VMEM default on every generation, so no vmem_limit override needed.
    if batch <= 128:
        return max(8, _round_up(batch, 8))
    if batch <= 2048:
        return _round_up(batch, 16) // 2
    return 1024


def _pad_rows(x, rows):
    # Row padding only when the batch does not divide the tile (power-of-two
    # PPO batches never pad, so no extra HBM pass in the common case).
    pad = rows - x.shape[0]
    if pad == 0:
        return x
    return jnp.pad(x, ((0, pad),) + ((0, 0),) * (x.ndim - 1))


def _common_call(kernel, packed, xs, extra_inputs, extra_specs, num_actions,
                 tm, bp):
    w1, b1, w2, b2 = packed["w1"], packed["b1"], packed["w2"], packed["b2"]
    d = xs.shape[1]
    h2 = w1.shape[1]
    out_lanes = w2.shape[1]

    flops = 2 * bp * (d * h2 + h2 * out_lanes)
    # exp runs over every output lane per row, plus a log and a reciprocal.
    transcendentals = bp * (out_lanes + 2)
    bytes_accessed = (xs.size * 4 + w1.size * 2 + b1.size * 4
                      + w2.size * 2 + b2.size * 4 + bp * out_lanes * 4
                      + sum(int(e.size) * 4 for e in extra_inputs))
    cost = pl.CostEstimate(flops=int(flops),
                           transcendentals=int(transcendentals),
                           bytes_accessed=int(bytes_accessed))

    in_specs = (
        [pl.BlockSpec((tm, d), lambda i: (i, 0))]          # state tile (pipelined)
        + extra_specs                                      # e.g. action tile
        + [pl.BlockSpec((d, h2), lambda i: (0, 0)),        # weights: VMEM-resident
           pl.BlockSpec((1, h2), lambda i: (0, 0)),
           pl.BlockSpec((h2, out_lanes), lambda i: (0, 0)),
           pl.BlockSpec((1, out_lanes), lambda i: (0, 0))]
    )

    return pl.pallas_call(
        functools.partial(kernel, num_actions=num_actions),
        out_shape=jax.ShapeDtypeStruct((bp, out_lanes), jnp.float32),
        grid=(bp // tm,),
        in_specs=in_specs,
        out_specs=pl.BlockSpec((tm, out_lanes), lambda i: (i, 0)),
        compiler_params=pltpu.CompilerParams(
            dimension_semantics=("parallel",)),
        cost_estimate=cost,
    )(xs, *extra_inputs, w1, b1, w2, b2)


@functools.partial(jax.jit, static_argnames=("num_actions",))
def evaluate(packed, state, action, *, num_actions):
    """Pallas equivalent of ActorCriticDiscrete.evaluate(state, action).

    Returns (action_log_probs [B,1], value [B,1], dist_entropy [B], probs [B,A]).
    """
    b = state.shape[0]
    tm = _tile_rows(b)
    bp = _round_up(b, tm)
    xs = _pad_rows(state.astype(jnp.float32), bp)          # f32 in; bf16 cast in-kernel
    acts = _pad_rows(action.reshape(b, 1).astype(jnp.int32), bp)

    slab = _common_call(
        _ac_eval_kernel, packed, xs,
        extra_inputs=[acts],
        extra_specs=[pl.BlockSpec((tm, 1), lambda i: (i, 0))],
        num_actions=num_actions, tm=tm, bp=bp)

    probs = slab[:b, :num_actions]
    value = slab[:b, num_actions:num_actions + 1]
    logp = slab[:b, num_actions + 1:num_actions + 2]
    ent = slab[:b, num_actions + 2]
    return logp, value, ent, probs


@functools.partial(jax.jit, static_argnames=("num_actions",))
def get_action(packed, state, *, num_actions):
    """Pallas equivalent of ActorCriticDiscrete.get_action(state).

    Returns (action_probs [B,A], value flattened [B]).
    """
    # TODO(synk): Categorical sampling from `probs` is left to the caller
    # (the torch.distributions object itself is not a tensor op).
    b = state.shape[0]
    tm = _tile_rows(b)
    bp = _round_up(b, tm)
    xs = _pad_rows(state.astype(jnp.float32), bp)

    slab = _common_call(
        _ac_act_kernel, packed, xs,
        extra_inputs=[], extra_specs=[],
        num_actions=num_actions, tm=tm, bp=bp)

    probs = slab[:b, :num_actions]
    value = slab[:b, num_actions]
    return probs, value


# ----------------------------------------------------------------------------
# Parameter init / packing
# ----------------------------------------------------------------------------
def init_params(key, input_size, num_actions, hidden_size,
                mean=0.0, std=0.1, bias=0.1):
    """Matches init_weights: weights ~ N(mean, std), biases = bias.
    Weights stored as [in, out] (transpose of torch's [out, in])."""
    ks = jax.random.split(key, 4)
    f = jnp.float32
    return {
        "w1a": (mean + std * jax.random.normal(ks[0], (input_size, hidden_size))).astype(f),
        "b1a": jnp.full((1, hidden_size), bias, f),
        "w2a": (mean + std * jax.random.normal(ks[1], (hidden_size, num_actions))).astype(f),
        "b2a": jnp.full((1, num_actions), bias, f),
        "w1c": (mean + std * jax.random.normal(ks[2], (input_size, hidden_size))).astype(f),
        "b1c": jnp.full((1, hidden_size), bias, f),
        "w2c": (mean + std * jax.random.normal(ks[3], (hidden_size, 1))).astype(f),
        "b2c": jnp.full((1, 1), bias, f),
    }


def pack_params(params):
    """Fuse actor/critic into two matmuls (done once, outside the kernel).

    w1: [D, 2H] = [w1a | w1c]  (bf16)
    w2: [2H, OUT_LANES] block-diagonal, lane-padded:
        [:H, :A] = w2a, [H:, A] = w2c, rest 0.   (bf16)
    Biases stay f32 (added after f32 accumulation).
    NOTE: D / 2H are intentionally NOT padded up to 128/256 — at D=16/H=32 the
    matmuls are latency-floor ops and padding would only add HBM/VMEM traffic.
    """
    w1a, w1c = params["w1a"], params["w1c"]
    h = w1a.shape[1]
    a = params["w2a"].shape[1]
    out_lanes = _round_up(a + 3, 128)          # probs|value|logp|ent + pad

    w1 = jnp.concatenate([w1a, w1c], axis=1)
    b1 = jnp.concatenate([params["b1a"], params["b1c"]], axis=1)

    w2 = jnp.zeros((2 * h, out_lanes), jnp.float32)
    w2 = w2.at[:h, :a].set(params["w2a"])
    w2 = w2.at[h:, a].set(params["w2c"][:, 0])
    b2 = jnp.zeros((1, out_lanes), jnp.float32)
    b2 = b2.at[0, :a].set(params["b2a"][0])
    b2 = b2.at[0, a].set(params["b2c"][0, 0])

    return {
        "w1": w1.astype(jnp.bfloat16),
        "b1": b1.astype(jnp.float32),
        "w2": w2.astype(jnp.bfloat16),
        "b2": b2.astype(jnp.float32),
    }


# ----------------------------------------------------------------------------
# Pure-JAX reference (same bf16 weight/activation rounding as the kernel)
# ----------------------------------------------------------------------------
def _reference(packed, state, action, num_actions):
    x = state.astype(jnp.bfloat16)
    h = jnp.maximum(
        jnp.dot(x, packed["w1"], preferred_element_type=jnp.float32) + packed["b1"],
        0.0)
    y = jnp.dot(h.astype(jnp.bfloat16), packed["w2"],
                preferred_element_type=jnp.float32) + packed["b2"]
    logits = y[:, :num_actions]
    value = y[:, num_actions:num_actions + 1]
    probs = jax.nn.softmax(logits, axis=-1)
    logp_all = jax.nn.log_softmax(logits, axis=-1)
    logp = jnp.take_along_axis(logp_all, action[:, None], axis=1)
    ent = -jnp.sum(probs * logp_all, axis=-1)
    return logp, value, ent, probs


# ----------------------------------------------------------------------------
if __name__ == "__main__":
    key = jax.random.PRNGKey(0)
    B, D, H, A = 8, 16, 32, 6   # batch, input_size, hidden_size, num_actions

    k_param, k_state, k_act = jax.random.split(key, 3)
    raw_params = init_params(k_param, input_size=D, num_actions=A, hidden_size=H)
    packed = pack_params(raw_params)

    state = jax.random.normal(k_state, (B, D), dtype=jnp.float32)
    action = jax.random.randint(k_act, (B,), 0, A, dtype=jnp.int32)

    logp, value, ent, probs = evaluate(packed, state, action, num_actions=A)
    jax.block_until_ready((logp, value, ent, probs))

    # Correctness vs. pure-JAX reference (tolerance covers bf16-rounded inputs
    # and weights; the softmax normalization itself is exact in the kernel).
    r_logp, r_value, r_ent, r_probs = _reference(packed, state, action, A)
    assert jnp.allclose(probs, r_probs, atol=5e-3, rtol=5e-3), "probs mismatch"
    assert jnp.allclose(logp, r_logp, atol=5e-3, rtol=5e-3), "logp mismatch"
    assert jnp.allclose(value, r_value, atol=5e-3, rtol=5e-3), "value mismatch"
    assert jnp.allclose(ent, r_ent, atol=5e-3, rtol=5e-3), "entropy mismatch"
    assert jnp.allclose(jnp.sum(probs, axis=-1), 1.0, atol=2e-3), "probs not normalized"

    # get_action path (dedicated lighter kernel).
    p2, v2 = get_action(packed, state, num_actions=A)
    jax.block_until_ready((p2, v2))
    assert jnp.allclose(p2, r_probs, atol=5e-3, rtol=5e-3), "get_action probs mismatch"
    assert jnp.allclose(v2, r_value[:, 0], atol=5e-3, rtol=5e-3), "get_action value mismatch"

    print("KERNEL_OK")
</pallas_src>

<mosaic_0001>
module attributes {stable_mosaic.version = 11 : i64} {
  func.func @_ac_eval_kernel(%arg0: i32, %arg1: memref<8x16xf32, #tpu.memory_space<vmem>>, %arg2: memref<8x1xi32, #tpu.memory_space<vmem>>, %arg3: memref<16x64xbf16, #tpu.memory_space<vmem>>, %arg4: memref<1x64xf32, #tpu.memory_space<vmem>>, %arg5: memref<64x128xbf16, #tpu.memory_space<vmem>>, %arg6: memref<1x128xf32, #tpu.memory_space<vmem>>, %arg7: memref<8x128xf32, #tpu.memory_space<vmem>>) attributes {dimension_semantics = [#tpu.dimension_semantics<parallel>], iteration_bounds = array<i64: 1>, scalar_prefetch = 0 : i64, scratch_operands = 0 : i64, tpu.core_type = #tpu.core_type<tc>, window_params = [{transform_indices = @transform_0, window_bounds = array<i64: 8, 16>}, {transform_indices = @transform_1, window_bounds = array<i64: 8, 1>}, {pipeline_mode = #tpu.pipeline_mode<synchronous>, transform_indices = @transform_2, window_bounds = array<i64: 16, 64>}, {pipeline_mode = #tpu.pipeline_mode<synchronous>, transform_indices = @transform_3, window_bounds = array<i64: 1, 64>}, {pipeline_mode = #tpu.pipeline_mode<synchronous>, transform_indices = @transform_4, window_bounds = array<i64: 64, 128>}, {pipeline_mode = #tpu.pipeline_mode<synchronous>, transform_indices = @transform_5, window_bounds = array<i64: 1, 128>}, {transform_indices = @transform_6, window_bounds = array<i64: 8, 128>}]} {
    %c0 = arith.constant 0 : index
    %c0_0 = arith.constant 0 : index
    %0 = vector.load %arg1[%c0, %c0_0] : memref<8x16xf32, #tpu.memory_space<vmem>>, vector<8x16xf32>
    %1 = arith.truncf %0 : vector<8x16xf32> to vector<8x16xbf16>
    %c0_1 = arith.constant 0 : index
    %c0_2 = arith.constant 0 : index
    %2 = vector.load %arg3[%c0_1, %c0_2] : memref<16x64xbf16, #tpu.memory_space<vmem>>, vector<16x64xbf16>
    %cst = arith.constant dense<0.000000e+00> : vector<8x64xf32>
    %3 = tpu.matmul %1, %2, %cst {dimension_numbers = #tpu.dot_dimension_numbers<[1], [0], [0], [1], [0, 0, 1, 1], [], []>} : vector<8x16xbf16>, vector<16x64xbf16>, vector<8x64xf32> -> vector<8x64xf32>
    %c0_3 = arith.constant 0 : index
    %c0_4 = arith.constant 0 : index
    %4 = vector.load %arg4[%c0_3, %c0_4] : memref<1x64xf32, #tpu.memory_space<vmem>>, vector<1x64xf32>
    %5 = vector.broadcast %4 : vector<1x64xf32> to vector<8x64xf32>
    %6 = arith.addf %3, %5 : vector<8x64xf32>
    %cst_5 = arith.constant 0.000000e+00 : f32
    %7 = vector.broadcast %cst_5 : f32 to vector<8x64xf32>
    %8 = arith.maximumf %6, %7 : vector<8x64xf32>
    %9 = arith.truncf %8 : vector<8x64xf32> to vector<8x64xbf16>
    %c0_6 = arith.constant 0 : index
    %c0_7 = arith.constant 0 : index
    %10 = vector.load %arg5[%c0_6, %c0_7] : memref<64x128xbf16, #tpu.memory_space<vmem>>, vector<64x128xbf16>
    %cst_8 = arith.constant dense<0.000000e+00> : vector<8x128xf32>
    %11 = tpu.matmul %9, %10, %cst_8 {dimension_numbers = #tpu.dot_dimension_numbers<[1], [0], [0], [1], [0, 0, 1, 1], [], []>} : vector<8x64xbf16>, vector<64x128xbf16>, vector<8x128xf32> -> vector<8x128xf32>
    %c0_9 = arith.constant 0 : index
    %c0_10 = arith.constant 0 : index
    %12 = vector.load %arg6[%c0_9, %c0_10] : memref<1x128xf32, #tpu.memory_space<vmem>>, vector<1x128xf32>
    %13 = vector.broadcast %12 : vector<1x128xf32> to vector<8x128xf32>
    %14 = arith.addf %11, %13 : vector<8x128xf32>
    %15 = tpu.iota {dimensions = array<i32: 1>} : vector<8x128xi32>
    %c6_i32 = arith.constant 6 : i32
    %16 = vector.broadcast %c6_i32 : i32 to vector<8x128xi32>
    %17 = arith.cmpi slt, %15, %16 : vector<8x128xi32>
    %cst_11 = arith.constant 0xFF800000 : f32
    %18 = vector.broadcast %cst_11 : f32 to vector<8x128xf32>
    %19 = arith.select %17, %14, %18 : vector<8x128xi1>, vector<8x128xf32>
    %cst_12 = arith.constant dense<0xFF800000> : vector<8xf32>
    %20 = vector.multi_reduction <maximumf>, %19, %cst_12 [1] : vector<8x128xf32> to vector<8xf32>
    %21 = vector.shape_cast %20 : vector<8xf32> to vector<8x1xf32>
    %22 = vector.broadcast %21 : vector<8x1xf32> to vector<8x128xf32>
    %23 = arith.subf %14, %22 : vector<8x128xf32>
    %cst_13 = arith.constant -3.000000e+01 : f32
    %24 = vector.broadcast %cst_13 : f32 to vector<8x128xf32>
    %25 = arith.select %17, %23, %24 : vector<8x128xi1>, vector<8x128xf32>
    %26 = math.exp %25 : vector<8x128xf32>
    %cst_14 = arith.constant dense<0.000000e+00> : vector<8xf32>
    %27 = vector.multi_reduction <add>, %26, %cst_14 [1] : vector<8x128xf32> to vector<8xf32>
    %28 = vector.shape_cast %27 : vector<8xf32> to vector<8x1xf32>
    %29 = math.log %28 : vector<8x1xf32>
    %30 = vector.broadcast %28 : vector<8x1xf32> to vector<8x128xf32>
    %31 = arith.divf %26, %30 : vector<8x128xf32>
    %c0_15 = arith.constant 0 : index
    %c0_16 = arith.constant 0 : index
    %32 = vector.load %arg2[%c0_15, %c0_16] : memref<8x1xi32, #tpu.memory_space<vmem>>, vector<8x1xi32>
    %33 = vector.broadcast %32 : vector<8x1xi32> to vector<8x128xi32>
    %34 = arith.cmpi eq, %15, %33 : vector<8x128xi32>
    %cst_17 = arith.constant 0.000000e+00 : f32
    %35 = vector.broadcast %cst_17 : f32 to vector<8x128xf32>
    %36 = arith.select %34, %25, %35 : vector<8x128xi1>, vector<8x128xf32>
    %cst_18 = arith.constant dense<0.000000e+00> : vector<8xf32>
    %37 = vector.multi_reduction <add>, %36, %cst_18 [1] : vector<8x128xf32> to vector<8xf32>
    %38 = vector.shape_cast %37 : vector<8xf32> to vector<8x1xf32>
    %39 = arith.subf %38, %29 : vector<8x1xf32>
    %40 = arith.mulf %31, %25 : vector<8x128xf32>
    %cst_19 = arith.constant dense<0.000000e+00> : vector<8xf32>
    %41 = vector.multi_reduction <add>, %40, %cst_19 [1] : vector<8x128xf32> to vector<8xf32>
    %42 = vector.shape_cast %41 : vector<8xf32> to vector<8x1xf32>
    %43 = arith.subf %29, %42 : vector<8x1xf32>
    %c6_i32_20 = arith.constant 6 : i32
    %44 = vector.broadcast %c6_i32_20 : i32 to vector<8x128xi32>
    %45 = arith.cmpi eq, %15, %44 : vector<8x128xi32>
    %c7_i32 = arith.constant 7 : i32
    %46 = vector.broadcast %c7_i32 : i32 to vector<8x128xi32>
    %47 = arith.cmpi eq, %15, %46 : vector<8x128xi32>
    %c8_i32 = arith.constant 8 : i32
    %48 = vector.broadcast %c8_i32 : i32 to vector<8x128xi32>
    %49 = arith.cmpi eq, %15, %48 : vector<8x128xi32>
    %cst_21 = arith.constant 0.000000e+00 : f32
    %50 = vector.shape_cast %43 : vector<8x1xf32> to vector<8x1xf32>
    %51 = vector.broadcast %50 : vector<8x1xf32> to vector<8x128xf32>
    %52 = vector.broadcast %cst_21 : f32 to vector<8x128xf32>
    %53 = arith.select %49, %51, %52 : vector<8x128xi1>, vector<8x128xf32>
    %54 = vector.shape_cast %39 : vector<8x1xf32> to vector<8x1xf32>
    %55 = vector.broadcast %54 : vector<8x1xf32> to vector<8x128xf32>
    %56 = arith.select %47, %55, %53 : vector<8x128xi1>, vector<8x128xf32>
    %57 = arith.select %45, %14, %56 : vector<8x128xi1>, vector<8x128xf32>
    %58 = arith.select %17, %31, %57 : vector<8x128xi1>, vector<8x128xf32>
    %c0_22 = arith.constant 0 : index
    %c0_23 = arith.constant 0 : index
    %59 = vector.load %arg7[%c0_22, %c0_23] : memref<8x128xf32, #tpu.memory_space<vmem>>, vector<8x128xf32>
    tpu.vector_store %arg7[%c0_22, %c0_23], %58 {strides = array<i32>} : memref<8x128xf32, #tpu.memory_space<vmem>>, vector<8x128xf32>,
    return
  }
  func.func @transform_0(%arg0: i32) -> (i32, i32) {
    %c0_i32 = arith.constant 0 : i32
    %c0_i32_0 = arith.constant 0 : i32
    return %arg0, %c0_i32 : i32, i32
  }
  func.func @transform_1(%arg0: i32) -> (i32, i32) {
    %c0_i32 = arith.constant 0 : i32
    %c0_i32_0 = arith.constant 0 : i32
    return %arg0, %c0_i32 : i32, i32
  }
  func.func @transform_2(%arg0: i32) -> (i32, i32) {
    %c0_i32 = arith.constant 0 : i32
    %c0_i32_0 = arith.constant 0 : i32
    %c0_i32_1 = arith.constant 0 : i32
    return %c0_i32, %c0_i32_0 : i32, i32
  }
  func.func @transform_3(%arg0: i32) -> (i32, i32) {
    %c0_i32 = arith.constant 0 : i32
    %c0_i32_0 = arith.constant 0 : i32
    %c0_i32_1 = arith.constant 0 : i32
    return %c0_i32, %c0_i32_0 : i32, i32
  }
  func.func @transform_4(%arg0: i32) -> (i32, i32) {
    %c0_i32 = arith.constant 0 : i32
    %c0_i32_0 = arith.constant 0 : i32
    %c0_i32_1 = arith.constant 0 : i32
    return %c0_i32, %c0_i32_0 : i32, i32
  }
  func.func @transform_5(%arg0: i32) -> (i32, i32) {
    %c0_i32 = arith.constant 0 : i32
    %c0_i32_0 = arith.constant 0 : i32
    %c0_i32_1 = arith.constant 0 : i32
    return %c0_i32, %c0_i32_0 : i32, i32
  }
  func.func @transform_6(%arg0: i32) -> (i32, i32) {
    %c0_i32 = arith.constant 0 : i32
    %c0_i32_0 = arith.constant 0 : i32
    return %arg0, %c0_i32 : i32, i32
  }
}

</mosaic_0001>

<bundles_post_ra>
// kernel: evaluate.1
= control target key start
LH: loop header
LB: loop body
LE: loop exit
PB: predicated region body
PF: predicated region fallthrough
CT: control target
= control target key end

     0   :  { %11 = vsyncpa [#allocation3], 0  ;;  %s436_s0 = inlined_call_operand.vmem [shape: f32[8,16], index: 0, kind: input, shape index: {}]   ;;  %s437_s1 = inlined_call_operand.vmem [shape: s32[8,1], index: 1, kind: input, shape index: {}]   ;;  %s438_s2 = inlined_call_operand.vmem [shape: bf16[16,64], index: 2, kind: input, shape index: {}]   ;;  %s439_s3 = inlined_call_operand.hbm [shape: f32[1,64], index: 3, kind: input, shape index: {}]   ;;  %s440_s4 = inlined_call_operand.hbm [shape: bf16[64,128], index: 4, kind: input, shape index: {}]   ;;  %s441_s5 = inlined_call_operand.hbm [shape: f32[1,128], index: 5, kind: input, shape index: {}]   ;;  %s442_s6 = inlined_call_operand.vmem [shape: f32[8,128], index: 6, kind: output, shape index: {}]  }
   0x1   :  { %12 = vsyncpa [#allocation5], 0  ;;  %s369_s21 = smov [#allocation4]  }
   0x2   :  { %s34_s22 = sshll.u32 %s369_s21, 4  ;;  %s35_s22 = int_to_ptr.vmem [resolvable:$true] %s34_s22 }
   0x3   :  { %s313_s23 = scalar_lea.vmem %s35_s22, 512  ;;  %p318_p1 = scmp.lt.s32.totalorder %s35_s22, %s35_s22 }
   0x4   :  { %p314_p0 = scmp.ne.s32.totalorder %s35_s22, %s313_s23  ;;  %p319_p2 = scmp.lt.s32.totalorder %s313_s23, %s313_s23 }
   0x6   :  { %p320_p3 = por %p319_p2, %p318_p1 }
   0x8   :  { %p321_p4 = pnand %p320_p3, %p314_p0 }
   0xa   :  { %324 = shalt.err (!%p321_p4)
}
   0xb   :  { %s370_s24 = smov 64   ;;  %s371_s25 = smov 4  }
   0xc   :  { %40 = dma.hbm_to_vmem [thread:$0]  %s440_s4, 512, %s35_s22, [#allocation5], %s370_s24, %s370_s24, %s371_s25  }
   0xd   :  { %s372_s28 = smov [#allocation2]   ;;  %s373_s30 = smov [#allocation6]  }
   0xe   :  { %s25_s29 = sshll.u32 %s372_s28, 4  ;;  %s47_s7 = sshll.u32 %s373_s30, 4  ;;  %s26_s29 = int_to_ptr.vmem [resolvable:$true] %s25_s29  ;;  %s48_s7 = int_to_ptr.vmem [resolvable:$true] %s47_s7 }
   0xf   :  { %s333_s8 = scalar_lea.vmem %s26_s29, 16  ;;  %s337_s9 = scalar_lea.vmem %s26_s29, 32 }
  0x10   :  { %p334_p5 = scmp.ne.s32.totalorder %s26_s29, %s333_s8  ;;  %p338_p6 = scmp.lt.s32.totalorder %s26_s29, %s26_s29 }
  0x11   :  { %p339_p7 = scmp.lt.s32.totalorder %s337_s9, %s333_s8 }
  0x13   :  { %p340_p8 = por %p339_p7, %p338_p6 }
  0x15   :  { %p341_p9 = pnand %p340_p8, %p334_p5 }
  0x17   :  { %344 = shalt.err (!%p341_p9)
}
  0x18   :  { %28 = dma.hbm_to_vmem [thread:$0]  %s439_s3, 16, %s26_s29, [#allocation3]  }
  0x19   :  { %s353_s12 = scalar_lea.vmem %s48_s7, 16  ;;  %s357_s4 = scalar_lea.vmem %s48_s7, 32 }
  0x1a   :  { %p354_p10 = scmp.ne.s32.totalorder %s48_s7, %s353_s12  ;;  %p358_p11 = scmp.lt.s32.totalorder %s48_s7, %s48_s7 }
  0x1b   :  { %p359_p12 = scmp.lt.s32.totalorder %s357_s4, %s353_s12 }
  0x1d   :  { %p360_p13 = por %p359_p12, %p358_p11 }
  0x1f   :  { %p361_p0 = pnand %p360_p13, %p354_p10 }
  0x21   :  { %364 = shalt.err (!%p361_p0)
}
  0x22   :  { %50 = dma.hbm_to_vmem [thread:$0]  %s441_s5, 16, %s48_s7, [#allocation5]  }
  0x23   :  { %365 = dma.done.wait [#allocation3], 16  }
  0x24   :  { %366 = vsyncadd [#allocation3], 4294967280 }
  0x25   :  { %367 = dma.done.wait [#allocation5], 528  }
  0x26   :  { %368 = vsyncadd [#allocation5], 4294966768  ;;  %v374_v0 = vmov 0.0   ;;  %vm375_vm0 = vmmov 0   ;;  %v294_v1 = vld [vmem:[%s438_s2] sm:$0xff]   ;;  %vm78_vm1 = vcmask 130048   ;;  %v207_v18 = vlaneseq }
  0x27   :  { %266 = vmatprep.subr.bf16.mxu0 %v374_v0  ;;  %268 = vmatprep.mubr.msk.bf16.mxu0 %vm375_vm0, %v374_v0  ;;  %v61_v2 = vld [vmem:[%s436_s0] sm:$0xff]  ;;  %v296_v5 = vld [vmem:[#allocation4 + $0x10] sm:$0xff]   ;;  %v297_v6 = vld [vmem:[#allocation4 + $0x8] sm:$0xff]   ;;  %vm163_vm2 = vcmask 523264   ;;  %v376_v17 = vmov 0  }
  0x28   :  { %272 = vmatprep.subr.bf16.mxu1 %v374_v0  ;;  %280 = vmatprep.mubr.msk.bf16.mxu1 %vm375_vm0, %v374_v0  ;;  %v62_v3 = vpack.c.bf16 %v61_v2, %v61_v2  ;;  %v295_v4 = vld [vmem:[#allocation4 + $0x18] sm:$0xff]   ;;  %v298_v7 = vld [vmem:[#allocation4] sm:$0xff]   ;;  %v208_v19 = vand.u32 127, %v207_v18 }
  0x29   :  { %267 = vmatpush3.bf16.msra.mxu0 %v294_v1  ;;  %273 = vmatpush3.bf16.msra.mxu1 %v295_v4  ;;  %v250_v8 = vld [vmem:[#allocation2] ss:$0 sm:$0xff]  ;;  %v253_v20 = vld [vmem:[#allocation6] ss:$0 sm:$0xff] }
  0x2a   :  { %274 = vmatprep.subr.bf16.mxu1 %v374_v0  ;;  %v223_v16 = vld [vmem:[%s437_s1] sm:$0xff]  ;;  %292 = vset.pattern.permute.xlu1 %v376_v17  ;;  %vm209_vm3 = vcmp.lt.s32.totalorder %v208_v19, 6  ;;  %vm238_vm5 = vcmp.eq.s32.totalorder %v208_v19, 8  ;;  %vm237_vm6 = vcmp.eq.s32.totalorder %v208_v19, 7  ;;  %vm236_vm7 = vcmp.eq.s32.totalorder %v208_v19, 6 }
  0x2b   :  { %293 = vset.pattern.permute.xlu0 %v376_v17  ;;  %225 = vperm.xlu1 %292, %v223_v16  }
  0x2c   :  { %269 = vmatmul.mubr.msk.bf16.vlgmr.msra.gmra.mxu0 %vm78_vm1, %v62_v3 }
  0x2d   :  { %275 = vmatpush3.bf16.msra.mxu1 %v296_v5 }
  0x2e   :  { %276 = vmatprep.subr.bf16.mxu1 %v374_v0 }
  0x31   :  { %277 = vmatpush3.bf16.msra.mxu1 %v297_v6 }
  0x32   :  { %278 = vmatprep.subr.bf16.mxu1 %v374_v0 }
  0x35   :  { %279 = vmatpush3.bf16.msra.mxu1 %v298_v7 }
  0xa6   :  { %v226_v31 = vpop.permute.xlu1 %225 }
  0xa7   :  { %vm227_vm4 = vcmp.eq.s32.totalorder %v208_v19, %v226_v31 }
  0xec   :  { %v116_v9 = vpop.f32.mrf.mxu0 }
  0xed   :  { %v117_v10 = vadd.f32 %v250_v8, %v116_v9 }
  0xee   :  { %v270_v11 = vpop.f32.mrf.mxu0 }
  0xef   :  { %v122_v12 = vmax.f32 %v117_v10, 0.0 }
  0xf0   :  { %v119_v13 = vpop.f32.mrf.mxu0 }
  0xf1   :  { %v123_v14 = vpack.c.bf16 %v122_v12, %v122_v12 }
  0xf2   :  { %v271_v15 = vpop.f32.mrf.mxu0 }
  0xf3   :  { %281 = vmatmul.mubr.msk.bf16.vlgmr.msra.gmra.mxu1 %vm163_vm2, %v123_v14 }
 0x1b3   :  { %v201_v21 = vpop.f32.mrf.mxu1 }
 0x1b4   :  { %v202_v22 = vadd.f32 %v253_v20, %v201_v21 }
 0x1b5   :  { %v282_v23 = vpop.f32.mrf.mxu1 }
 0x1b6   :  { %v210_v24 = vsel %vm209_vm3, %v202_v22, -inf }
 0x1b7   :  { %211 = vmax.xlane.f32.xlu0 %v210_v24  ;;  %v204_v25 = vpop.f32.mrf.mxu1 }
 0x1b9   :  { %v283_v26 = vpop.f32.mrf.mxu1 }
 0x240   :  { %v212_v27 = vpop.xlane.xlu0 %211 }
 0x241   :  { %v213_v28 = vsub.f32 %v202_v22, %v212_v27 }
 0x243   :  { %v214_v29 = vsel %vm209_vm3, %v213_v28, -30.0 }
 0x244   :  { %v215_v30 = vmul.f32 1.442695, %v214_v29  ;;  %v228_v33 = vsel %vm227_vm4, %v214_v29, 0.0 }
 0x246   :  { %299 = vpow2.f32 %v215_v30 }
 0x253   :  { %v300_v32 = vpop.eup %299 }
 0x254   :  { %217 = vadd.xlane.f32.xlu0 %v300_v32 }
 0x258   :  { %229 = vadd.xlane.f32.xlu0 %v228_v33 }
 0x2dd   :  { %v218_v34 = vpop.xlane.xlu0 %217 }
 0x2de   :  { %301 = vrcp.f32 %v218_v34 }
 0x2df   :  { %303 = vlog2.f32 %v218_v34 }
 0x2e1   :  { %v230_v41 = vpop.xlane.xlu0 %229 }
 0x2eb   :  { %v302_v35 = vpop.eup %301 }
 0x2ec   :  { %v222_v36 = vmul.f32 %v302_v35, %v300_v32  ;;  %v304_v38 = vpop.eup %303 }
 0x2ed   :  { %v220_v39 = vmul.f32 0.6931472, %v304_v38 }
 0x2ee   :  { %v232_v37 = vmul.f32 %v222_v36, %v214_v29 }
 0x2ef   :  { %v231_v43 = vsub.f32 %v230_v41, %v220_v39 }
 0x2f0   :  { %233 = vadd.xlane.f32.xlu1 %v232_v37 }
 0x379   :  { %v234_v40 = vpop.xlane.xlu1 %233 }
 0x37a   :  { %v235_v42 = vsub.f32 %v220_v39, %v234_v40 }
 0x37c   :  { %v239_v44 = vsel %vm238_vm5, %v235_v42, 0.0 }
 0x37d   :  { %v240_v45 = vsel %vm237_vm6, %v231_v43, %v239_v44 }
 0x37e   :  { %v241_v46 = vsel %vm236_vm7, %v202_v22, %v240_v45 }
 0x37f   :  { %v242_v47 = vsel %vm209_vm3, %v222_v36, %v241_v46 }
 0x380   :  { %243 = vst [vmem:[%s442_s6] sm:$0xff] %v242_v47 }
 0x381   :  { %248 = vsyncpa [#allocation3], 1 }
 0x382   :  { %249 = vsyncpa [#allocation5], 1 }

</bundles_post_ra>
